<compile_context>
chip_gen: v5e
topology: v5e:2x2
jax: 0.10.0
libtpu: 0.0.40
codegen_flags: <defaults>
</compile_context>

<pallas_src>
import jax
import jax.numpy as jnp
from jax.experimental import pallas as pl
from jax.experimental.pallas import tpu as pltpu


LN_EPS = 1e-5          # nn.LayerNorm default
LEAKY_SLOPE = 0.01     # nn.LeakyReLU default


def _round_up(x, m):
    return ((x + m - 1) // m) * m


def _layer_norm(h, gamma, beta):
    # One-pass stats: E[x], E[x^2]  -> var = E[x^2] - E[x]^2  (2 XLU reductions).
    mu = jnp.mean(h, axis=-1, keepdims=True)
    ms = jnp.mean(h * h, axis=-1, keepdims=True)
    var = ms - mu * mu
    return (h - mu) * jax.lax.rsqrt(var + LN_EPS) * gamma + beta


def _leaky_relu(h):
    return jnp.where(h > 0, h, LEAKY_SLOPE * h)


def actor_kernel(
    x_ref,
    w1_ref, b1_ref, g1_ref, be1_ref,
    w2_ref, b2_ref, g2_ref, be2_ref,
    w3_ref, b3_ref, g3_ref, be3_ref,
    wmu_ref, bmu_ref,
    o_ref,
):
    # Block 1: Linear -> LayerNorm -> Dropout(identity) -> LeakyReLU
    x = x_ref[...].astype(jnp.bfloat16)
    h = jnp.dot(x, w1_ref[...], preferred_element_type=jnp.float32) + b1_ref[...]
    h = _leaky_relu(_layer_norm(h, g1_ref[...], be1_ref[...]))

    # Block 2: Linear -> LayerNorm -> LeakyReLU
    h = jnp.dot(h.astype(jnp.bfloat16), w2_ref[...],
                preferred_element_type=jnp.float32) + b2_ref[...]
    h = _leaky_relu(_layer_norm(h, g2_ref[...], be2_ref[...]))

    # Block 3: Linear -> LayerNorm -> LeakyReLU
    h = jnp.dot(h.astype(jnp.bfloat16), w3_ref[...],
                preferred_element_type=jnp.float32) + b3_ref[...]
    h = _leaky_relu(_layer_norm(h, g3_ref[...], be3_ref[...]))

    # Output head: Linear -> Tanh   (lane-padded to 128 output columns)
    out = jnp.dot(h.astype(jnp.bfloat16), wmu_ref[...],
                  preferred_element_type=jnp.float32) + bmu_ref[...]
    o_ref[...] = jnp.tanh(out).astype(o_ref.dtype)


def actor_forward(x, params, *, block_b=512):
    """x: (B, num_inputs) float32.  params: dict (see init_actor_params)."""
    B, NI = x.shape
    H = params["w1"].shape[1]
    A = params["wmu"].shape[1]

    # ---- batch tiling: pad B to a multiple of the batch tile (>=8 sublanes) ----
    tb = min(block_b, _round_up(B, 8))
    B_pad = _round_up(B, tb)
    if B_pad != B:
        x = jnp.pad(x, ((0, B_pad - B), (0, 0)))

    # ---- lane-dense output head: pad A up to a multiple of 128 lanes ----
    A_pad = max(128, _round_up(A, 128))

    # bf16 matmul operands; biases / LN affine params stay f32.
    w1 = params["w1"].astype(jnp.bfloat16)
    w2 = params["w2"].astype(jnp.bfloat16)
    w3 = params["w3"].astype(jnp.bfloat16)
    wmu = jnp.pad(params["wmu"], ((0, 0), (0, A_pad - A))).astype(jnp.bfloat16)
    bmu = jnp.pad(params["bmu"], ((0, 0), (0, A_pad - A)))

    args = (
        x,
        w1, params["b1"], params["g1"], params["be1"],
        w2, params["b2"], params["g2"], params["be2"],
        w3, params["b3"], params["g3"], params["be3"],
        wmu, bmu,
    )

    def resident(a):
        # Weight/bias stays in the same VMEM block for every grid step.
        return pl.BlockSpec(a.shape, lambda i: (0,) * a.ndim)

    in_specs = [pl.BlockSpec((tb, NI), lambda i: (i, 0))]
    in_specs += [resident(a) for a in args[1:]]

    out = pl.pallas_call(
        actor_kernel,
        out_shape=jax.ShapeDtypeStruct((B_pad, A_pad), jnp.float32),
        grid=(B_pad // tb,),
        in_specs=in_specs,
        out_specs=pl.BlockSpec((tb, A_pad), lambda i: (i, 0)),
        compiler_params=pltpu.CompilerParams(
            dimension_semantics=("parallel",)),
    )(*args)

    return out[:B, :A]


def init_actor_params(key, num_inputs, hidden_size, action_space):
    """Deterministic synthetic init (PyTorch-style uniform fan-in bounds)."""
    keys = jax.random.split(key, 8)

    def linear(kw, kb, fan_in, fan_out):
        bound = 1.0 / jnp.sqrt(float(fan_in))
        # stored transposed vs. PyTorch: (in, out) so kernel computes x @ W + b
        w = jax.random.uniform(kw, (fan_in, fan_out), jnp.float32, -bound, bound)
        b = jax.random.uniform(kb, (1, fan_out), jnp.float32, -bound, bound)
        return w, b

    w1, b1 = linear(keys[0], keys[1], num_inputs, hidden_size)
    w2, b2 = linear(keys[2], keys[3], hidden_size, hidden_size)
    w3, b3 = linear(keys[4], keys[5], hidden_size, hidden_size)
    wmu, bmu = linear(keys[6], keys[7], hidden_size, action_space)

    ones = jnp.ones((1, hidden_size), jnp.float32)
    zeros = jnp.zeros((1, hidden_size), jnp.float32)

    return {
        "w1": w1, "b1": b1, "g1": ones, "be1": zeros,
        "w2": w2, "b2": b2, "g2": ones, "be2": zeros,
        "w3": w3, "b3": b3, "g3": ones, "be3": zeros,
        "wmu": wmu, "bmu": bmu,
    }


def actor_forward_ref(x, p):
    """Pure-JAX reference (same bf16-operand matmuls, f32 elementwise)."""
    def mm(a, w, b):
        return jnp.dot(a.astype(jnp.bfloat16), w.astype(jnp.bfloat16),
                       preferred_element_type=jnp.float32) + b

    def ln(h, g, b):
        mu = jnp.mean(h, -1, keepdims=True)
        var = jnp.mean((h - mu) ** 2, -1, keepdims=True)
        return (h - mu) / jnp.sqrt(var + LN_EPS) * g + b

    def lrelu(h):
        return jnp.where(h > 0, h, LEAKY_SLOPE * h)

    h = lrelu(ln(mm(x, p["w1"], p["b1"]), p["g1"], p["be1"]))
    h = lrelu(ln(mm(h, p["w2"], p["b2"]), p["g2"], p["be2"]))
    h = lrelu(ln(mm(h, p["w3"], p["b3"]), p["g3"], p["be3"]))
    return jnp.tanh(mm(h, p["wmu"], p["bmu"]))


if __name__ == "__main__":
    # Small shapes consistent with the module: state dim 16, hidden 32, action dim 4.
    B, NUM_INPUTS, HIDDEN, ACTIONS = 8, 16, 32, 4

    key = jax.random.PRNGKey(0)
    kx, kp = jax.random.split(key)

    x = jax.random.normal(kx, (B, NUM_INPUTS), jnp.float32)
    params = init_actor_params(kp, NUM_INPUTS, HIDDEN, ACTIONS)

    out = actor_forward(x, params)
    out = jax.block_until_ready(out)

    ref = actor_forward_ref(x, params)
    assert out.shape == (B, ACTIONS)
    assert jnp.max(jnp.abs(out - ref)) < 5e-3, float(jnp.max(jnp.abs(out - ref)))

    print("KERNEL_OK")
</pallas_src>

<mosaic_0001>
module attributes {stable_mosaic.version = 11 : i64} {
  func.func @actor_kernel(%arg0: i32, %arg1: memref<8x16xf32, #tpu.memory_space<vmem>>, %arg2: memref<16x32xbf16, #tpu.memory_space<vmem>>, %arg3: memref<1x32xf32, #tpu.memory_space<vmem>>, %arg4: memref<1x32xf32, #tpu.memory_space<vmem>>, %arg5: memref<1x32xf32, #tpu.memory_space<vmem>>, %arg6: memref<32x32xbf16, #tpu.memory_space<vmem>>, %arg7: memref<1x32xf32, #tpu.memory_space<vmem>>, %arg8: memref<1x32xf32, #tpu.memory_space<vmem>>, %arg9: memref<1x32xf32, #tpu.memory_space<vmem>>, %arg10: memref<32x32xbf16, #tpu.memory_space<vmem>>, %arg11: memref<1x32xf32, #tpu.memory_space<vmem>>, %arg12: memref<1x32xf32, #tpu.memory_space<vmem>>, %arg13: memref<1x32xf32, #tpu.memory_space<vmem>>, %arg14: memref<32x128xbf16, #tpu.memory_space<vmem>>, %arg15: memref<1x128xf32, #tpu.memory_space<vmem>>, %arg16: memref<8x128xf32, #tpu.memory_space<vmem>>) attributes {dimension_semantics = [#tpu.dimension_semantics<parallel>], iteration_bounds = array<i64: 1>, scalar_prefetch = 0 : i64, scratch_operands = 0 : i64, tpu.core_type = #tpu.core_type<tc>, window_params = [{transform_indices = @transform_0, window_bounds = array<i64: 8, 16>}, {pipeline_mode = #tpu.pipeline_mode<synchronous>, transform_indices = @transform_1, window_bounds = array<i64: 16, 32>}, {pipeline_mode = #tpu.pipeline_mode<synchronous>, transform_indices = @transform_2, window_bounds = array<i64: 1, 32>}, {pipeline_mode = #tpu.pipeline_mode<synchronous>, transform_indices = @transform_3, window_bounds = array<i64: 1, 32>}, {pipeline_mode = #tpu.pipeline_mode<synchronous>, transform_indices = @transform_4, window_bounds = array<i64: 1, 32>}, {pipeline_mode = #tpu.pipeline_mode<synchronous>, transform_indices = @transform_5, window_bounds = array<i64: 32, 32>}, {pipeline_mode = #tpu.pipeline_mode<synchronous>, transform_indices = @transform_6, window_bounds = array<i64: 1, 32>}, {pipeline_mode = #tpu.pipeline_mode<synchronous>, transform_indices = @transform_7, window_bounds = array<i64: 1, 32>}, {pipeline_mode = #tpu.pipeline_mode<synchronous>, transform_indices = @transform_8, window_bounds = array<i64: 1, 32>}, {pipeline_mode = #tpu.pipeline_mode<synchronous>, transform_indices = @transform_9, window_bounds = array<i64: 32, 32>}, {pipeline_mode = #tpu.pipeline_mode<synchronous>, transform_indices = @transform_10, window_bounds = array<i64: 1, 32>}, {pipeline_mode = #tpu.pipeline_mode<synchronous>, transform_indices = @transform_11, window_bounds = array<i64: 1, 32>}, {pipeline_mode = #tpu.pipeline_mode<synchronous>, transform_indices = @transform_12, window_bounds = array<i64: 1, 32>}, {pipeline_mode = #tpu.pipeline_mode<synchronous>, transform_indices = @transform_13, window_bounds = array<i64: 32, 128>}, {pipeline_mode = #tpu.pipeline_mode<synchronous>, transform_indices = @transform_14, window_bounds = array<i64: 1, 128>}, {transform_indices = @transform_15, window_bounds = array<i64: 8, 128>}]} {
    %c0 = arith.constant 0 : index
    %c0_0 = arith.constant 0 : index
    %0 = vector.load %arg1[%c0, %c0_0] : memref<8x16xf32, #tpu.memory_space<vmem>>, vector<8x16xf32>
    %1 = arith.truncf %0 : vector<8x16xf32> to vector<8x16xbf16>
    %c0_1 = arith.constant 0 : index
    %c0_2 = arith.constant 0 : index
    %2 = vector.load %arg2[%c0_1, %c0_2] : memref<16x32xbf16, #tpu.memory_space<vmem>>, vector<16x32xbf16>
    %cst = arith.constant dense<0.000000e+00> : vector<8x32xf32>
    %3 = tpu.matmul %1, %2, %cst {dimension_numbers = #tpu.dot_dimension_numbers<[1], [0], [0], [1], [0, 0, 1, 1], [], []>} : vector<8x16xbf16>, vector<16x32xbf16>, vector<8x32xf32> -> vector<8x32xf32>
    %c0_3 = arith.constant 0 : index
    %c0_4 = arith.constant 0 : index
    %4 = vector.load %arg3[%c0_3, %c0_4] : memref<1x32xf32, #tpu.memory_space<vmem>>, vector<1x32xf32>
    %5 = vector.broadcast %4 : vector<1x32xf32> to vector<8x32xf32>
    %6 = arith.addf %3, %5 : vector<8x32xf32>
    %c0_5 = arith.constant 0 : index
    %c0_6 = arith.constant 0 : index
    %7 = vector.load %arg4[%c0_5, %c0_6] : memref<1x32xf32, #tpu.memory_space<vmem>>, vector<1x32xf32>
    %c0_7 = arith.constant 0 : index
    %c0_8 = arith.constant 0 : index
    %8 = vector.load %arg5[%c0_7, %c0_8] : memref<1x32xf32, #tpu.memory_space<vmem>>, vector<1x32xf32>
    %cst_9 = arith.constant dense<0.000000e+00> : vector<8xf32>
    %9 = vector.multi_reduction <add>, %6, %cst_9 [1] : vector<8x32xf32> to vector<8xf32>
    %10 = vector.shape_cast %9 : vector<8xf32> to vector<8x1xf32>
    %cst_10 = arith.constant 3.200000e+01 : f32
    %11 = vector.broadcast %cst_10 : f32 to vector<8x1xf32>
    %12 = arith.divf %10, %11 : vector<8x1xf32>
    %13 = arith.mulf %6, %6 : vector<8x32xf32>
    %cst_11 = arith.constant dense<0.000000e+00> : vector<8xf32>
    %14 = vector.multi_reduction <add>, %13, %cst_11 [1] : vector<8x32xf32> to vector<8xf32>
    %15 = vector.shape_cast %14 : vector<8xf32> to vector<8x1xf32>
    %cst_12 = arith.constant 3.200000e+01 : f32
    %16 = vector.broadcast %cst_12 : f32 to vector<8x1xf32>
    %17 = arith.divf %15, %16 : vector<8x1xf32>
    %18 = arith.mulf %12, %12 : vector<8x1xf32>
    %19 = arith.subf %17, %18 : vector<8x1xf32>
    %20 = vector.broadcast %12 : vector<8x1xf32> to vector<8x32xf32>
    %21 = arith.subf %6, %20 : vector<8x32xf32>
    %cst_13 = arith.constant 9.99999974E-6 : f32
    %22 = vector.broadcast %cst_13 : f32 to vector<8x1xf32>
    %23 = arith.addf %19, %22 : vector<8x1xf32>
    %24 = math.rsqrt %23 : vector<8x1xf32>
    %25 = vector.broadcast %24 : vector<8x1xf32> to vector<8x32xf32>
    %26 = arith.mulf %21, %25 : vector<8x32xf32>
    %27 = vector.broadcast %7 : vector<1x32xf32> to vector<8x32xf32>
    %28 = arith.mulf %26, %27 : vector<8x32xf32>
    %29 = vector.broadcast %8 : vector<1x32xf32> to vector<8x32xf32>
    %30 = arith.addf %28, %29 : vector<8x32xf32>
    %cst_14 = arith.constant 0.000000e+00 : f32
    %31 = vector.broadcast %cst_14 : f32 to vector<8x32xf32>
    %32 = arith.cmpf ogt, %30, %31 : vector<8x32xf32>
    %cst_15 = arith.constant 0.00999999977 : f32
    %33 = vector.broadcast %cst_15 : f32 to vector<8x32xf32>
    %34 = arith.mulf %33, %30 : vector<8x32xf32>
    %35 = arith.select %32, %30, %34 : vector<8x32xi1>, vector<8x32xf32>
    %36 = arith.truncf %35 : vector<8x32xf32> to vector<8x32xbf16>
    %c0_16 = arith.constant 0 : index
    %c0_17 = arith.constant 0 : index
    %37 = vector.load %arg6[%c0_16, %c0_17] : memref<32x32xbf16, #tpu.memory_space<vmem>>, vector<32x32xbf16>
    %cst_18 = arith.constant dense<0.000000e+00> : vector<8x32xf32>
    %38 = tpu.matmul %36, %37, %cst_18 {dimension_numbers = #tpu.dot_dimension_numbers<[1], [0], [0], [1], [0, 0, 1, 1], [], []>} : vector<8x32xbf16>, vector<32x32xbf16>, vector<8x32xf32> -> vector<8x32xf32>
    %c0_19 = arith.constant 0 : index
    %c0_20 = arith.constant 0 : index
    %39 = vector.load %arg7[%c0_19, %c0_20] : memref<1x32xf32, #tpu.memory_space<vmem>>, vector<1x32xf32>
    %40 = vector.broadcast %39 : vector<1x32xf32> to vector<8x32xf32>
    %41 = arith.addf %38, %40 : vector<8x32xf32>
    %c0_21 = arith.constant 0 : index
    %c0_22 = arith.constant 0 : index
    %42 = vector.load %arg8[%c0_21, %c0_22] : memref<1x32xf32, #tpu.memory_space<vmem>>, vector<1x32xf32>
    %c0_23 = arith.constant 0 : index
    %c0_24 = arith.constant 0 : index
    %43 = vector.load %arg9[%c0_23, %c0_24] : memref<1x32xf32, #tpu.memory_space<vmem>>, vector<1x32xf32>
    %cst_25 = arith.constant dense<0.000000e+00> : vector<8xf32>
    %44 = vector.multi_reduction <add>, %41, %cst_25 [1] : vector<8x32xf32> to vector<8xf32>
    %45 = vector.shape_cast %44 : vector<8xf32> to vector<8x1xf32>
    %cst_26 = arith.constant 3.200000e+01 : f32
    %46 = vector.broadcast %cst_26 : f32 to vector<8x1xf32>
    %47 = arith.divf %45, %46 : vector<8x1xf32>
    %48 = arith.mulf %41, %41 : vector<8x32xf32>
    %cst_27 = arith.constant dense<0.000000e+00> : vector<8xf32>
    %49 = vector.multi_reduction <add>, %48, %cst_27 [1] : vector<8x32xf32> to vector<8xf32>
    %50 = vector.shape_cast %49 : vector<8xf32> to vector<8x1xf32>
    %cst_28 = arith.constant 3.200000e+01 : f32
    %51 = vector.broadcast %cst_28 : f32 to vector<8x1xf32>
    %52 = arith.divf %50, %51 : vector<8x1xf32>
    %53 = arith.mulf %47, %47 : vector<8x1xf32>
    %54 = arith.subf %52, %53 : vector<8x1xf32>
    %55 = vector.broadcast %47 : vector<8x1xf32> to vector<8x32xf32>
    %56 = arith.subf %41, %55 : vector<8x32xf32>
    %cst_29 = arith.constant 9.99999974E-6 : f32
    %57 = vector.broadcast %cst_29 : f32 to vector<8x1xf32>
    %58 = arith.addf %54, %57 : vector<8x1xf32>
    %59 = math.rsqrt %58 : vector<8x1xf32>
    %60 = vector.broadcast %59 : vector<8x1xf32> to vector<8x32xf32>
    %61 = arith.mulf %56, %60 : vector<8x32xf32>
    %62 = vector.broadcast %42 : vector<1x32xf32> to vector<8x32xf32>
    %63 = arith.mulf %61, %62 : vector<8x32xf32>
    %64 = vector.broadcast %43 : vector<1x32xf32> to vector<8x32xf32>
    %65 = arith.addf %63, %64 : vector<8x32xf32>
    %cst_30 = arith.constant 0.000000e+00 : f32
    %66 = vector.broadcast %cst_30 : f32 to vector<8x32xf32>
    %67 = arith.cmpf ogt, %65, %66 : vector<8x32xf32>
    %cst_31 = arith.constant 0.00999999977 : f32
    %68 = vector.broadcast %cst_31 : f32 to vector<8x32xf32>
    %69 = arith.mulf %68, %65 : vector<8x32xf32>
    %70 = arith.select %67, %65, %69 : vector<8x32xi1>, vector<8x32xf32>
    %71 = arith.truncf %70 : vector<8x32xf32> to vector<8x32xbf16>
    %c0_32 = arith.constant 0 : index
    %c0_33 = arith.constant 0 : index
    %72 = vector.load %arg10[%c0_32, %c0_33] : memref<32x32xbf16, #tpu.memory_space<vmem>>, vector<32x32xbf16>
    %cst_34 = arith.constant dense<0.000000e+00> : vector<8x32xf32>
    %73 = tpu.matmul %71, %72, %cst_34 {dimension_numbers = #tpu.dot_dimension_numbers<[1], [0], [0], [1], [0, 0, 1, 1], [], []>} : vector<8x32xbf16>, vector<32x32xbf16>, vector<8x32xf32> -> vector<8x32xf32>
    %c0_35 = arith.constant 0 : index
    %c0_36 = arith.constant 0 : index
    %74 = vector.load %arg11[%c0_35, %c0_36] : memref<1x32xf32, #tpu.memory_space<vmem>>, vector<1x32xf32>
    %75 = vector.broadcast %74 : vector<1x32xf32> to vector<8x32xf32>
    %76 = arith.addf %73, %75 : vector<8x32xf32>
    %c0_37 = arith.constant 0 : index
    %c0_38 = arith.constant 0 : index
    %77 = vector.load %arg12[%c0_37, %c0_38] : memref<1x32xf32, #tpu.memory_space<vmem>>, vector<1x32xf32>
    %c0_39 = arith.constant 0 : index
    %c0_40 = arith.constant 0 : index
    %78 = vector.load %arg13[%c0_39, %c0_40] : memref<1x32xf32, #tpu.memory_space<vmem>>, vector<1x32xf32>
    %cst_41 = arith.constant dense<0.000000e+00> : vector<8xf32>
    %79 = vector.multi_reduction <add>, %76, %cst_41 [1] : vector<8x32xf32> to vector<8xf32>
    %80 = vector.shape_cast %79 : vector<8xf32> to vector<8x1xf32>
    %cst_42 = arith.constant 3.200000e+01 : f32
    %81 = vector.broadcast %cst_42 : f32 to vector<8x1xf32>
    %82 = arith.divf %80, %81 : vector<8x1xf32>
    %83 = arith.mulf %76, %76 : vector<8x32xf32>
    %cst_43 = arith.constant dense<0.000000e+00> : vector<8xf32>
    %84 = vector.multi_reduction <add>, %83, %cst_43 [1] : vector<8x32xf32> to vector<8xf32>
    %85 = vector.shape_cast %84 : vector<8xf32> to vector<8x1xf32>
    %cst_44 = arith.constant 3.200000e+01 : f32
    %86 = vector.broadcast %cst_44 : f32 to vector<8x1xf32>
    %87 = arith.divf %85, %86 : vector<8x1xf32>
    %88 = arith.mulf %82, %82 : vector<8x1xf32>
    %89 = arith.subf %87, %88 : vector<8x1xf32>
    %90 = vector.broadcast %82 : vector<8x1xf32> to vector<8x32xf32>
    %91 = arith.subf %76, %90 : vector<8x32xf32>
    %cst_45 = arith.constant 9.99999974E-6 : f32
    %92 = vector.broadcast %cst_45 : f32 to vector<8x1xf32>
    %93 = arith.addf %89, %92 : vector<8x1xf32>
    %94 = math.rsqrt %93 : vector<8x1xf32>
    %95 = vector.broadcast %94 : vector<8x1xf32> to vector<8x32xf32>
    %96 = arith.mulf %91, %95 : vector<8x32xf32>
    %97 = vector.broadcast %77 : vector<1x32xf32> to vector<8x32xf32>
    %98 = arith.mulf %96, %97 : vector<8x32xf32>
    %99 = vector.broadcast %78 : vector<1x32xf32> to vector<8x32xf32>
    %100 = arith.addf %98, %99 : vector<8x32xf32>
    %cst_46 = arith.constant 0.000000e+00 : f32
    %101 = vector.broadcast %cst_46 : f32 to vector<8x32xf32>
    %102 = arith.cmpf ogt, %100, %101 : vector<8x32xf32>
    %cst_47 = arith.constant 0.00999999977 : f32
    %103 = vector.broadcast %cst_47 : f32 to vector<8x32xf32>
    %104 = arith.mulf %103, %100 : vector<8x32xf32>
    %105 = arith.select %102, %100, %104 : vector<8x32xi1>, vector<8x32xf32>
    %106 = arith.truncf %105 : vector<8x32xf32> to vector<8x32xbf16>
    %c0_48 = arith.constant 0 : index
    %c0_49 = arith.constant 0 : index
    %107 = vector.load %arg14[%c0_48, %c0_49] : memref<32x128xbf16, #tpu.memory_space<vmem>>, vector<32x128xbf16>
    %cst_50 = arith.constant dense<0.000000e+00> : vector<8x128xf32>
    %108 = tpu.matmul %106, %107, %cst_50 {dimension_numbers = #tpu.dot_dimension_numbers<[1], [0], [0], [1], [0, 0, 1, 1], [], []>} : vector<8x32xbf16>, vector<32x128xbf16>, vector<8x128xf32> -> vector<8x128xf32>
    %c0_51 = arith.constant 0 : index
    %c0_52 = arith.constant 0 : index
    %109 = vector.load %arg15[%c0_51, %c0_52] : memref<1x128xf32, #tpu.memory_space<vmem>>, vector<1x128xf32>
    %110 = vector.broadcast %109 : vector<1x128xf32> to vector<8x128xf32>
    %111 = arith.addf %108, %110 : vector<8x128xf32>
    %112 = math.tanh %111 : vector<8x128xf32>
    %c0_53 = arith.constant 0 : index
    %c0_54 = arith.constant 0 : index
    %113 = vector.load %arg16[%c0_53, %c0_54] : memref<8x128xf32, #tpu.memory_space<vmem>>, vector<8x128xf32>
    tpu.vector_store %arg16[%c0_53, %c0_54], %112 {strides = array<i32>} : memref<8x128xf32, #tpu.memory_space<vmem>>, vector<8x128xf32>,
    return
  }
  func.func @transform_0(%arg0: i32) -> (i32, i32) {
    %c0_i32 = arith.constant 0 : i32
    %c0_i32_0 = arith.constant 0 : i32
    return %arg0, %c0_i32 : i32, i32
  }
  func.func @transform_1(%arg0: i32) -> (i32, i32) {
    %c0_i32 = arith.constant 0 : i32
    %c0_i32_0 = arith.constant 0 : i32
    %c0_i32_1 = arith.constant 0 : i32
    return %c0_i32, %c0_i32_0 : i32, i32
  }
  func.func @transform_2(%arg0: i32) -> (i32, i32) {
    %c0_i32 = arith.constant 0 : i32
    %c0_i32_0 = arith.constant 0 : i32
    %c0_i32_1 = arith.constant 0 : i32
    return %c0_i32, %c0_i32_0 : i32, i32
  }
  func.func @transform_3(%arg0: i32) -> (i32, i32) {
    %c0_i32 = arith.constant 0 : i32
    %c0_i32_0 = arith.constant 0 : i32
    %c0_i32_1 = arith.constant 0 : i32
    return %c0_i32, %c0_i32_0 : i32, i32
  }
  func.func @transform_4(%arg0: i32) -> (i32, i32) {
    %c0_i32 = arith.constant 0 : i32
    %c0_i32_0 = arith.constant 0 : i32
    %c0_i32_1 = arith.constant 0 : i32
    return %c0_i32, %c0_i32_0 : i32, i32
  }
  func.func @transform_5(%arg0: i32) -> (i32, i32) {
    %c0_i32 = arith.constant 0 : i32
    %c0_i32_0 = arith.constant 0 : i32
    %c0_i32_1 = arith.constant 0 : i32
    return %c0_i32, %c0_i32_0 : i32, i32
  }
  func.func @transform_6(%arg0: i32) -> (i32, i32) {
    %c0_i32 = arith.constant 0 : i32
    %c0_i32_0 = arith.constant 0 : i32
    %c0_i32_1 = arith.constant 0 : i32
    return %c0_i32, %c0_i32_0 : i32, i32
  }
  func.func @transform_7(%arg0: i32) -> (i32, i32) {
    %c0_i32 = arith.constant 0 : i32
    %c0_i32_0 = arith.constant 0 : i32
    %c0_i32_1 = arith.constant 0 : i32
    return %c0_i32, %c0_i32_0 : i32, i32
  }
  func.func @transform_8(%arg0: i32) -> (i32, i32) {
    %c0_i32 = arith.constant 0 : i32
    %c0_i32_0 = arith.constant 0 : i32
    %c0_i32_1 = arith.constant 0 : i32
    return %c0_i32, %c0_i32_0 : i32, i32
  }
  func.func @transform_9(%arg0: i32) -> (i32, i32) {
    %c0_i32 = arith.constant 0 : i32
    %c0_i32_0 = arith.constant 0 : i32
    %c0_i32_1 = arith.constant 0 : i32
    return %c0_i32, %c0_i32_0 : i32, i32
  }
  func.func @transform_10(%arg0: i32) -> (i32, i32) {
    %c0_i32 = arith.constant 0 : i32
    %c0_i32_0 = arith.constant 0 : i32
    %c0_i32_1 = arith.constant 0 : i32
    return %c0_i32, %c0_i32_0 : i32, i32
  }
  func.func @transform_11(%arg0: i32) -> (i32, i32) {
    %c0_i32 = arith.constant 0 : i32
    %c0_i32_0 = arith.constant 0 : i32
    %c0_i32_1 = arith.constant 0 : i32
    return %c0_i32, %c0_i32_0 : i32, i32
  }
  func.func @transform_12(%arg0: i32) -> (i32, i32) {
    %c0_i32 = arith.constant 0 : i32
    %c0_i32_0 = arith.constant 0 : i32
    %c0_i32_1 = arith.constant 0 : i32
    return %c0_i32, %c0_i32_0 : i32, i32
  }
  func.func @transform_13(%arg0: i32) -> (i32, i32) {
    %c0_i32 = arith.constant 0 : i32
    %c0_i32_0 = arith.constant 0 : i32
    %c0_i32_1 = arith.constant 0 : i32
    return %c0_i32, %c0_i32_0 : i32, i32
  }
  func.func @transform_14(%arg0: i32) -> (i32, i32) {
    %c0_i32 = arith.constant 0 : i32
    %c0_i32_0 = arith.constant 0 : i32
    %c0_i32_1 = arith.constant 0 : i32
    return %c0_i32, %c0_i32_0 : i32, i32
  }
  func.func @transform_15(%arg0: i32) -> (i32, i32) {
    %c0_i32 = arith.constant 0 : i32
    %c0_i32_0 = arith.constant 0 : i32
    return %arg0, %c0_i32 : i32, i32
  }
}

</mosaic_0001>

<bundles_post_ra>
// kernel: tpu_custom_call.1
= control target key start
LH: loop header
LB: loop body
LE: loop exit
PB: predicated region body
PF: predicated region fallthrough
CT: control target
= control target key end

     0   :  { %20 = vsyncpa [#allocation3], 0  ;;  %s784_s0 = inlined_call_operand.hbm [shape: f32[8,16], index: 0, kind: input, shape index: {}]   ;;  %s785_s1 = inlined_call_operand.hbm [shape: bf16[16,32], index: 1, kind: input, shape index: {}]   ;;  %s786_s2 = inlined_call_operand.vmem [shape: f32[1,32], index: 2, kind: input, shape index: {}]   ;;  %s787_s3 = inlined_call_operand.vmem [shape: f32[1,32], index: 3, kind: input, shape index: {}]   ;;  %s788_s4 = inlined_call_operand.vmem [shape: f32[1,32], index: 4, kind: input, shape index: {}]   ;;  %s789_s5 = inlined_call_operand.hbm [shape: bf16[32,32], index: 5, kind: input, shape index: {}]   ;;  %s790_s6 = inlined_call_operand.vmem [shape: f32[1,32], index: 6, kind: input, shape index: {}]   ;;  %s791_s7 = inlined_call_operand.vmem [shape: f32[1,32], index: 7, kind: input, shape index: {}]   ;;  %s792_s8 = inlined_call_operand.vmem [shape: f32[1,32], index: 8, kind: input, shape index: {}]   ;;  %s793_s9 = inlined_call_operand.hbm [shape: bf16[32,32], index: 9, kind: input, shape index: {}]   ;;  %s794_s10 = inlined_call_operand.vmem [shape: f32[1,32], index: 10, kind: input, shape index: {}]   ;;  %s795_s11 = inlined_call_operand.vmem [shape: f32[1,32], index: 11, kind: input, shape index: {}]   ;;  %s796_s12 = inlined_call_operand.vmem [shape: f32[1,32], index: 12, kind: input, shape index: {}]   ;;  %s797_s13 = inlined_call_operand.hbm [shape: bf16[32,128], index: 13, kind: input, shape index: {}]   ;;  %s798_s14 = inlined_call_operand.vmem [shape: f32[1,128], index: 14, kind: input, shape index: {}]   ;;  %s799_s15 = inlined_call_operand.hbm [shape: f32[8,128], index: 15, kind: output, shape index: {}]  }
   0x1   :  { %21 = vsyncpa [#allocation6], 0 }
   0x2   :  { %22 = vsyncpa [#allocation9], 0  ;;  %s39_s20 = sshll.u32 %s785_s1, 4  ;;  %s40_s20 = int_to_ptr.hbm [resolvable:$true] %s39_s20 }
   0x3   :  { %23 = vsyncpa [#allocation4], 0  ;;  %s630_s21 = smov [#allocation5]   ;;  %s77_s25 = sshll.u32 %s793_s9, 4  ;;  %s78_s25 = int_to_ptr.hbm [resolvable:$true] %s77_s25 }
   0x4   :  { %s41_s22 = sshll.u32 %s630_s21, 4  ;;  %s631_s26 = smov 64   ;;  %s42_s22 = int_to_ptr.vmem [resolvable:$true] %s41_s22 }
   0x5   :  { %s632_s27 = smov 4   ;;  %s633_s28 = smov [#allocation8]  }
   0x6   :  { %47 = dma.hbm_to_vmem [thread:$0]  %s40_s20, 128, %s42_s22, [#allocation6], %s631_s26, %s631_s26, %s632_s27  }
   0x7   :  { %s79_s29 = sshll.u32 %s633_s28, 4  ;;  %s29_s17 = sshll.u32 %s784_s0, 4  ;;  %s80_s29 = int_to_ptr.vmem [resolvable:$true] %s79_s29  ;;  %s30_s17 = int_to_ptr.hbm [resolvable:$true] %s29_s17 }
   0x8   :  { %85 = dma.hbm_to_vmem [thread:$0]  %s78_s25, 256, %s80_s29, [#allocation9], %s631_s26, %s631_s26, %s632_s27  }
   0x9   :  { %s58_s19 = sshll.u32 %s789_s5, 4  ;;  %s634_s21 = smov [#allocation2]   ;;  %s59_s19 = int_to_ptr.hbm [resolvable:$true] %s58_s19 }
   0xa   :  { %s31_s23 = sshll.u32 %s634_s21, 4  ;;  %s635_s9 = smov [#allocation7]   ;;  %s32_s23 = int_to_ptr.vmem [resolvable:$true] %s31_s23 }
   0xb   :  { %34 = dma.hbm_to_vmem [thread:$0]  %s30_s17, 128, %s32_s23, [#allocation3]  }
   0xc   :  { %s60_s20 = sshll.u32 %s635_s9, 4  ;;  %s96_s28 = sshll.u32 %s797_s13, 4  ;;  %s61_s20 = int_to_ptr.vmem [resolvable:$true] %s60_s20  ;;  %s97_s28 = int_to_ptr.hbm [resolvable:$true] %s96_s28 }
   0xd   :  { %66 = dma.hbm_to_vmem [thread:$0]  %s59_s19, 256, %s61_s20, [#allocation6], %s631_s26, %s631_s26, %s632_s27  }
   0xe   :  { %s636_s0 = smov [#allocation10]  }
   0xf   :  { %s98_s25 = sshll.u32 %s636_s0, 4  ;;  %s99_s25 = int_to_ptr.vmem [resolvable:$true] %s98_s25 }
  0x10   :  { %104 = dma.hbm_to_vmem [thread:$0]  %s97_s28, 256, %s99_s25, [#allocation9], %s631_s26, %s631_s26, %s632_s27  }
  0x11   :  { %622 = dma.done.wait [#allocation3], 128  }
  0x12   :  { %623 = vsyncadd [#allocation3], 4294967168 }
  0x13   :  { %624 = dma.done.wait [#allocation6], 384  }
  0x14   :  { %625 = vsyncadd [#allocation6], 4294966912 }
  0x15   :  { %626 = dma.done.wait [#allocation9], 512  }
  0x16   :  { %627 = vsyncadd [#allocation9], 4294966784  ;;  %v442_v0 = vld [vmem:[#allocation5] sm:$0xff]  ;;  %v128_v1 = vld [vmem:[#allocation2] sm:$0xff]  ;;  %vm142_vm0 = vcmask 130048   ;;  %vm161_vm1 = vcmask 261120  }
  0x17   :  { %v129_v2 = vpack.c.bf16 %v128_v1, %v128_v1  ;;  %153 = vmatpush.bf16.msra.mxu0 %v442_v0  ;;  %v458_v3 = vld [vmem:[%s786_s2] ss:$0 sm:$0xff]  ;;  %v637_v10 = vmov 32.0   ;;  %v444_v17 = vld [vmem:[#allocation7 + $0x8] sm:$0xff]  ;;  %v443_v19 = vld [vmem:[#allocation7] sm:$0xff] }
  0x18   :  { %468 = vrcp.f32 %v637_v10  ;;  %234 = vmatpush.bf16.msra.mxu1 %v444_v17  ;;  %v459_v33 = vld [vmem:[%s787_s3] ss:$0 sm:$0xff]  ;;  %v446_v50 = vld [vmem:[#allocation8 + $0x8] sm:$0xff] }
  0x19   :  { %v460_v36 = vld [vmem:[%s788_s4] ss:$0 sm:$0xff]  ;;  %308 = vmatpush.bf16.msra.mxu2 %v446_v50 }
  0x1a   :  { %414 = vmatmul.msk.bf16.vlgmr.msra.gmra.mxu0 %vm142_vm0, %v129_v2  ;;  %v461_v42 = vld [vmem:[%s790_s6] ss:$0 sm:$0xff] }
  0x1b   :  { %v445_v51 = vld [vmem:[#allocation8] sm:$0xff] }
  0x1c   :  { %235 = vmatpush.bf16.msra.mxu1 %v443_v19  ;;  %v462_v1 = vld [vmem:[%s791_s7] ss:$0 sm:$0xff]  ;;  %v448_v19 = vld [vmem:[#allocation10 + $0x8] sm:$0xff] }
  0x1d   :  { %309 = vmatpush.bf16.msra.mxu2 %v445_v51  ;;  %v464_v10 = vld [vmem:[%s794_s10] ss:$0 sm:$0xff]  ;;  %382 = vmatpush.bf16.msra.mxu3 %v448_v19 }
  0x1e   :  { %v469_v11 = vpop.eup %468 }
  0x1f   :  { %v166_v12 = vmul.f32 32.0, %v469_v11  ;;  %vm170_vm2 = vweird.f32 %v469_v11 }
  0x21   :  { %v167_v13 = vsub.f32 1.0, %v166_v12 }
  0x23   :  { %v168_v14 = vmul.f32 %v469_v11, %v167_v13 }
  0x25   :  { %v169_v15 = vadd.f32 %v469_v11, %v168_v14 }
  0x27   :  { %v739_v18 = vsel %vm170_vm2, %v469_v11, %v169_v15 }
  0x97   :  { %v155_v4 = vpop.f32.mrf.mxu0 }
  0x98   :  { %v156_v5 = vadd.f32 %v458_v3, %v155_v4  ;;  %v463_v4 = vld [vmem:[%s792_s8] ss:$0 sm:$0xff] }
  0x9a   :  { %v162_v6 = vsel %vm161_vm1, %v156_v5, 0.0  ;;  %v173_v7 = vmul.f32 %v156_v5, %v156_v5 }
  0x9b   :  { %163 = vadd.xlane.f32.xlu0 %v162_v6 }
  0x9c   :  { %v174_v9 = vsel %vm161_vm1, %v173_v7, 0.0 }
  0x9f   :  { %v157_v8 = vpop.f32.mrf.mxu0 }
  0xa3   :  { %175 = vadd.xlane.f32.xlu0 %v174_v9 }
 0x10e   :  { %v164_v16 = vpop.xlane.xlu0 %163 }
 0x10f   :  { %v172_v20 = vmul.f32 %v739_v18, %v164_v16 }
 0x111   :  { %v178_v22 = vmul.f32 %v172_v20, %v172_v20  ;;  %v180_v32 = vsub.f32 %v156_v5, %v172_v20  ;;  %v447_v20 = vld [vmem:[#allocation10] sm:$0xff] }
 0x112   :  { %383 = vmatpush.bf16.msra.mxu3 %v447_v20 }
 0x116   :  { %v176_v21 = vpop.xlane.xlu0 %175 }
 0x117   :  { %v177_v23 = vmul.f32 %v176_v21, %v739_v18 }
 0x119   :  { %v179_v24 = vsub.f32 %v177_v23, %v178_v22 }
 0x11b   :  { %v181_v25 = vadd.f32 1e-05, %v179_v24 }
 0x11d   :  { %470 = vrsqrt.f32 %v181_v25  ;;  %vm188_vm4 = vweird.f32 %v181_v25 }
 0x123   :  { %v471_v26 = vpop.eup %470 }
 0x124   :  { %v183_v27 = vmul.f32 %v471_v26, %v181_v25  ;;  %vm189_vm3 = vweird.f32 %v471_v26 }
 0x125   :  { %vm190_vm5 = vmor %vm188_vm4, %vm189_vm3 }
 0x126   :  { %v184_v28 = vmul.f32 %v471_v26, %v183_v27 }
 0x128   :  { %v185_v29 = vmul.f32 0.5, %v184_v28 }
 0x12a   :  { %v186_v30 = vsub.f32 1.5, %v185_v29 }
 0x12c   :  { %v187_v31 = vmul.f32 %v471_v26, %v186_v30 }
 0x12e   :  { %v191_v34 = vsel %vm190_vm5, %v471_v26, %v187_v31 }
 0x12f   :  { %v192_v35 = vmul.f32 %v191_v34, %v180_v32  ;;  %v465_v34 = vld [vmem:[%s795_s11] ss:$0 sm:$0xff]  ;;  %s638_s11 = smov [#allocation11]  }
 0x130   :  { %s396_s9 = sshll.u32 %s638_s11, 4  ;;  %s397_s9 = int_to_ptr.vmem [resolvable:$true] %s396_s9 }
 0x131   :  { %v196_v37 = vmul.f32 %v459_v33, %v192_v35 }
 0x133   :  { %v200_v38 = vadd.f32 %v460_v36, %v196_v37 }
 0x135   :  { %vm201_vm6 = vcmp.gt.f32.partialorder %v200_v38, 0.0  ;;  %v202_v39 = vmul.f32 0.01, %v200_v38 }
 0x137   :  { %v203_v40 = vsel %vm201_vm6, %v200_v38, %v202_v39 }
 0x138   :  { %v204_v41 = vpack.c.bf16 %v203_v40, %v203_v40 }
 0x13a   :  { %423 = vmatmul.msk.bf16.vlgmr.msra.gmra.mxu1 %vm161_vm1, %v204_v41 }
 0x1b7   :  { %v237_v43 = vpop.f32.mrf.mxu1 }
 0x1b8   :  { %v238_v44 = vadd.f32 %v461_v42, %v237_v43  ;;  %v467_v42 = vld [vmem:[%s798_s14] ss:$0 sm:$0xff] }
 0x1ba   :  { %v243_v45 = vsel %vm161_vm1, %v238_v44, 0.0  ;;  %v247_v46 = vmul.f32 %v238_v44, %v238_v44 }
 0x1bb   :  { %244 = vadd.xlane.f32.xlu1 %v243_v45 }
 0x1bc   :  { %v248_v48 = vsel %vm161_vm1, %v247_v46, 0.0 }
 0x1bf   :  { %v239_v47 = vpop.f32.mrf.mxu1 }
 0x1c3   :  { %249 = vadd.xlane.f32.xlu1 %v248_v48 }
 0x22e   :  { %v245_v49 = vpop.xlane.xlu1 %244 }
 0x22f   :  { %v246_v52 = vmul.f32 %v245_v49, %v739_v18 }
 0x231   :  { %v252_v54 = vmul.f32 %v246_v52, %v246_v52  ;;  %v254_v0 = vsub.f32 %v238_v44, %v246_v52 }
 0x236   :  { %v250_v53 = vpop.xlane.xlu1 %249 }
 0x237   :  { %v251_v55 = vmul.f32 %v250_v53, %v739_v18 }
 0x239   :  { %v253_v56 = vsub.f32 %v251_v55, %v252_v54 }
 0x23b   :  { %v255_v57 = vadd.f32 1e-05, %v253_v56 }
 0x23d   :  { %472 = vrsqrt.f32 %v255_v57  ;;  %vm262_vm8 = vweird.f32 %v255_v57 }
 0x243   :  { %v473_v58 = vpop.eup %472 }
 0x244   :  { %v257_v59 = vmul.f32 %v473_v58, %v255_v57  ;;  %vm263_vm7 = vweird.f32 %v473_v58 }
 0x245   :  { %vm264_vm9 = vmor %vm262_vm8, %vm263_vm7 }
 0x246   :  { %v258_v60 = vmul.f32 %v473_v58, %v257_v59 }
 0x248   :  { %v259_v61 = vmul.f32 0.5, %v258_v60 }
 0x24a   :  { %v260_v62 = vsub.f32 1.5, %v259_v61 }
 0x24c   :  { %v261_v63 = vmul.f32 %v473_v58, %v260_v62 }
 0x24e   :  { %v265_v2 = vsel %vm264_vm9, %v473_v58, %v261_v63 }
 0x24f   :  { %v266_v3 = vmul.f32 %v265_v2, %v254_v0 }
 0x251   :  { %v270_v5 = vmul.f32 %v462_v1, %v266_v3 }
 0x253   :  { %v274_v6 = vadd.f32 %v463_v4, %v270_v5 }
 0x255   :  { %vm275_vm10 = vcmp.gt.f32.partialorder %v274_v6, 0.0  ;;  %v276_v7 = vmul.f32 0.01, %v274_v6 }
 0x257   :  { %v277_v8 = vsel %vm275_vm10, %v274_v6, %v276_v7 }
 0x258   :  { %v278_v9 = vpack.c.bf16 %v277_v8, %v277_v8 }
 0x25a   :  { %432 = vmatmul.msk.bf16.vlgmr.msra.gmra.mxu2 %vm161_vm1, %v278_v9 }
 0x2dd   :  { %v311_v11 = vpop.f32.mrf.mxu2 }
 0x2de   :  { %v312_v12 = vadd.f32 %v464_v10, %v311_v11 }
 0x2e0   :  { %v317_v13 = vsel %vm161_vm1, %v312_v12, 0.0  ;;  %v321_v14 = vmul.f32 %v312_v12, %v312_v12 }
 0x2e1   :  { %318 = vadd.xlane.f32.xlu2 %v317_v13 }
 0x2e2   :  { %v322_v16 = vsel %vm161_vm1, %v321_v14, 0.0 }
 0x2e5   :  { %v313_v15 = vpop.f32.mrf.mxu2 }
 0x2e9   :  { %323 = vadd.xlane.f32.xlu2 %v322_v16 }
 0x354   :  { %v319_v17 = vpop.xlane.xlu2 %318 }
 0x355   :  { %v320_v21 = vmul.f32 %v319_v17, %v739_v18 }
 0x357   :  { %v326_v23 = vmul.f32 %v320_v21, %v320_v21  ;;  %v328_v33 = vsub.f32 %v312_v12, %v320_v21 }
 0x35c   :  { %v324_v22 = vpop.xlane.xlu2 %323 }
 0x35d   :  { %v325_v24 = vmul.f32 %v324_v22, %v739_v18  ;;  %v466_v18 = vld [vmem:[%s796_s12] ss:$0 sm:$0xff]  ;;  %s398_s12 = sshll.u32 %s799_s15, 4  ;;  %s399_s12 = int_to_ptr.hbm [resolvable:$true] %s398_s12 }
 0x35f   :  { %v327_v25 = vsub.f32 %v325_v24, %v326_v23 }
 0x361   :  { %v329_v26 = vadd.f32 1e-05, %v327_v25 }
 0x363   :  { %474 = vrsqrt.f32 %v329_v26  ;;  %vm336_vm12 = vweird.f32 %v329_v26 }
 0x369   :  { %v475_v27 = vpop.eup %474 }
 0x36a   :  { %v331_v28 = vmul.f32 %v475_v27, %v329_v26  ;;  %vm337_vm11 = vweird.f32 %v475_v27 }
 0x36b   :  { %vm338_vm13 = vmor %vm336_vm12, %vm337_vm11 }
 0x36c   :  { %v332_v29 = vmul.f32 %v475_v27, %v331_v28 }
 0x36e   :  { %v333_v30 = vmul.f32 0.5, %v332_v29 }
 0x370   :  { %v334_v31 = vsub.f32 1.5, %v333_v30 }
 0x372   :  { %v335_v32 = vmul.f32 %v475_v27, %v334_v31 }
 0x374   :  { %v339_v35 = vsel %vm338_vm13, %v475_v27, %v335_v32 }
 0x375   :  { %v340_v36 = vmul.f32 %v339_v35, %v328_v33 }
 0x377   :  { %v344_v37 = vmul.f32 %v465_v34, %v340_v36 }
 0x379   :  { %v348_v38 = vadd.f32 %v466_v18, %v344_v37 }
 0x37b   :  { %vm349_vm14 = vcmp.gt.f32.partialorder %v348_v38, 0.0  ;;  %v350_v39 = vmul.f32 0.01, %v348_v38 }
 0x37d   :  { %v351_v40 = vsel %vm349_vm14, %v348_v38, %v350_v39 }
 0x37e   :  { %v352_v41 = vpack.c.bf16 %v351_v40, %v351_v40 }
 0x380   :  { %441 = vmatmul.msk.bf16.vlgmr.msra.gmra.mxu3 %vm161_vm1, %v352_v41 }
 0x403   :  { %v385_v43 = vpop.f32.mrf.mxu3 }
 0x404   :  { %v386_v44 = vadd.f32 %v467_v42, %v385_v43 }
 0x406   :  { %476 = vtanh.f32 %v386_v44 }
 0x40b   :  { %v387_v45 = vpop.f32.mrf.mxu3 }
 0x40c   :  { %v477_v46 = vpop.eup %476 }
 0x40d   :  { %390 = vst [vmem:[#allocation11] sm:$0xff] %v477_v46 }
 0x40e   :  { %401 = dma.vmem_to_hbm [thread:$0]  %s397_s9, 128, %s399_s12, [#allocation4]  }
 0x40f   :  { %628 = dma.done.wait [#allocation4], 128  }
 0x410   :  { %629 = vsyncadd [#allocation4], 4294967168 }
 0x411   :  { %406 = vsyncpa [#allocation3], 1 }
 0x412   :  { %407 = vsyncpa [#allocation6], 1 }
 0x413   :  { %408 = vsyncpa [#allocation9], 1 }
 0x414   :  { %409 = vsyncpa [#allocation4], 1 }

</bundles_post_ra>
